<compile_context>
chip_gen: v6e
topology: v6e:2x2x1
jax: 0.10.0
libtpu: 0.0.40
codegen_flags: <defaults>
</compile_context>

<pallas_src>
import jax
import jax.numpy as jnp
import numpy as np
from jax.experimental import pallas as pl
from jax.experimental.pallas import tpu as pltpu

IN_DIM = 2            # input feature dim of the model
HID_DIM = 3           # hid_dim from __init__
LANES = 512           # lane (last) dim of each dense slab (multiple of 128)
TARGET_TILE_ROWS = 1024   # rows of LANES per grid step -> 512K lanes/tile,
                          # ~12 MiB double-buffered (input + output) in VMEM
MIN_GRID = 4          # keep >= 4 grid steps when possible (v7x 2-TC sharding)


def _model_kernel(a_ref, b_ref, x_ref, o_ref):
    # a_ref: SMEM (HID_DIM, IN_DIM)        b_ref: SMEM (1, HID_DIM)
    # x_ref: VMEM (IN_DIM, tile_r, LANES)  o_ref: VMEM (tile_r, LANES)
    x0 = x_ref[0]                     # (tile_r, LANES) dense slab: x[:, 0]
    x1 = x_ref[1]                     # (tile_r, LANES) dense slab: x[:, 1]
    acc = jnp.zeros_like(x0)
    for j in range(HID_DIM):          # tiny, fully unrolled at trace time
        f = a_ref[j, 0] * x0 + a_ref[j, 1] * x1    # feature_j = x @ A[j].T
        acc = acc + b_ref[0, j] * (f * f)          # += B[0,j] * feature_j**2
    o_ref[...] = acc.astype(o_ref.dtype)


def _choose_tile_rows(n_rows):
    """Rows-of-LANES per grid step: big tiles, but keep >= MIN_GRID steps."""
    if n_rows <= 8:
        return n_rows                 # single tile == full array (tiny input)
    tile_r = min(TARGET_TILE_ROWS, n_rows)
    if n_rows >= MIN_GRID * 8:        # enough work to split across cores
        tile_r = min(tile_r, pl.cdiv(n_rows, MIN_GRID))
    return max(8, (tile_r // 8) * 8)  # sublane-aligned


def model_forward(x, A, B):
    """x: (N, 2) f32, A: (hid_dim, 2) f32, B: (1, hid_dim) f32 -> (N,) f32."""
    N = x.shape[0]
    n_lanes = ((N + LANES - 1) // LANES) * LANES
    n_rows = n_lanes // LANES
    tile_r = _choose_tile_rows(n_rows)
    n_rows_pad = ((n_rows + tile_r - 1) // tile_r) * tile_r
    n_pad = n_rows_pad * LANES
    grid = n_rows_pad // tile_r

    # Feature-major, sublane-dense slabs: (IN_DIM, n_rows_pad, LANES).
    # Transpose+pad+reshape is a single fused XLA pass over x.
    # TODO(synk): if upstream can produce x in feature-major layout, this
    # extra HBM pass disappears entirely.
    xt = jnp.pad(x.T.astype(jnp.float32), ((0, 0), (0, n_pad - N)))
    xs = xt.reshape(IN_DIM, n_rows_pad, LANES)

    cost = pl.CostEstimate(
        flops=18 * n_pad,                       # ~6 flops per hidden feature
        transcendentals=0,
        bytes_accessed=(IN_DIM + 1) * 4 * n_pad)  # read 8 B/row, write 4 B/row

    out_p = pl.pallas_call(
        _model_kernel,
        out_shape=jax.ShapeDtypeStruct((n_rows_pad, LANES), jnp.float32),
        grid=(grid,),
        in_specs=[
            pl.BlockSpec(memory_space=pltpu.MemorySpace.SMEM),      # A (3, 2)
            pl.BlockSpec(memory_space=pltpu.MemorySpace.SMEM),      # B (1, 3)
            pl.BlockSpec((IN_DIM, tile_r, LANES), lambda i: (0, i, 0)),
        ],
        out_specs=pl.BlockSpec((tile_r, LANES), lambda i: (i, 0)),
        compiler_params=pltpu.CompilerParams(
            dimension_semantics=("parallel",),
            vmem_limit_bytes=32 * 1024 * 1024),
        cost_estimate=cost,
    )(A.astype(jnp.float32), B.astype(jnp.float32), xs)

    # Un-pad; equivalent to the PyTorch squeeze(1).
    return out_p.reshape(-1)[:N]


def _reference(x, A, B):
    feat = (x @ A.T) ** 2
    return (feat @ B.T)[:, 0]


if __name__ == "__main__":
    key = jax.random.PRNGKey(0)
    kx, ka, kb, kx2 = jax.random.split(key, 4)

    A = jax.random.normal(ka, (HID_DIM, IN_DIM), jnp.float32)
    B = jax.random.normal(kb, (1, HID_DIM), jnp.float32)

    # Small check (single tile, full-array block).
    N = 8
    x = jax.random.normal(kx, (N, IN_DIM), jnp.float32)
    out = model_forward(x, A, B)
    jax.block_until_ready(out)
    ref = _reference(x, A, B)
    np.testing.assert_allclose(np.asarray(out), np.asarray(ref),
                               rtol=1e-5, atol=1e-5)
    assert out.shape == (N,)

    # Multi-tile check (grid > 1, row padding and slab reshape exercised).
    N2 = 5000
    x2 = jax.random.normal(kx2, (N2, IN_DIM), jnp.float32)
    out2 = model_forward(x2, A, B)
    jax.block_until_ready(out2)
    ref2 = _reference(x2, A, B)
    np.testing.assert_allclose(np.asarray(out2), np.asarray(ref2),
                               rtol=1e-5, atol=1e-5)
    assert out2.shape == (N2,)

    print("KERNEL_OK")
</pallas_src>

<mosaic_0001>
module attributes {stable_mosaic.version = 11 : i64} {
  func.func @_model_kernel(%arg0: i32, %arg1: memref<3x2xf32, #tpu.memory_space<smem>>, %arg2: memref<1x3xf32, #tpu.memory_space<smem>>, %arg3: memref<2x1x512xf32, #tpu.memory_space<vmem>>, %arg4: memref<1x512xf32, #tpu.memory_space<vmem>>) attributes {dimension_semantics = [#tpu.dimension_semantics<parallel>], iteration_bounds = array<i64: 1>, scalar_prefetch = 0 : i64, scratch_operands = 0 : i64, tpu.core_type = #tpu.core_type<tc>, window_params = [{transform_indices = @transform_0, window_bounds = array<i64: 3, 2>}, {transform_indices = @transform_1, window_bounds = array<i64: 1, 3>}, {transform_indices = @transform_2, window_bounds = array<i64: 2, 1, 512>}, {transform_indices = @transform_3, window_bounds = array<i64: 1, 512>}]} {
    %c0 = arith.constant 0 : index
    %c0_0 = arith.constant 0 : index
    %c0_1 = arith.constant 0 : index
    %0 = vector.load %arg3[%c0, %c0_0, %c0_1] : memref<2x1x512xf32, #tpu.memory_space<vmem>>, vector<1x1x512xf32>
    %1 = vector.shape_cast %0 : vector<1x1x512xf32> to vector<1x512xf32>
    %c1 = arith.constant 1 : index
    %c0_2 = arith.constant 0 : index
    %c0_3 = arith.constant 0 : index
    %2 = vector.load %arg3[%c1, %c0_2, %c0_3] : memref<2x1x512xf32, #tpu.memory_space<vmem>>, vector<1x1x512xf32>
    %3 = vector.shape_cast %2 : vector<1x1x512xf32> to vector<1x512xf32>
    %cst = arith.constant 0.000000e+00 : f32
    %4 = vector.broadcast %cst : f32 to vector<1x512xf32>
    %c0_4 = arith.constant 0 : index
    %c0_5 = arith.constant 0 : index
    %5 = memref.load %arg1[%c0_4, %c0_5] : memref<3x2xf32, #tpu.memory_space<smem>>
    %6 = vector.broadcast %5 : f32 to vector<1x512xf32>
    %7 = arith.mulf %6, %1 : vector<1x512xf32>
    %c0_6 = arith.constant 0 : index
    %c1_7 = arith.constant 1 : index
    %8 = memref.load %arg1[%c0_6, %c1_7] : memref<3x2xf32, #tpu.memory_space<smem>>
    %9 = vector.broadcast %8 : f32 to vector<1x512xf32>
    %10 = arith.mulf %9, %3 : vector<1x512xf32>
    %11 = arith.addf %7, %10 : vector<1x512xf32>
    %c0_8 = arith.constant 0 : index
    %c0_9 = arith.constant 0 : index
    %12 = memref.load %arg2[%c0_8, %c0_9] : memref<1x3xf32, #tpu.memory_space<smem>>
    %13 = arith.mulf %11, %11 : vector<1x512xf32>
    %14 = vector.broadcast %12 : f32 to vector<1x512xf32>
    %15 = arith.mulf %14, %13 : vector<1x512xf32>
    %16 = arith.addf %4, %15 : vector<1x512xf32>
    %c1_10 = arith.constant 1 : index
    %c0_11 = arith.constant 0 : index
    %17 = memref.load %arg1[%c1_10, %c0_11] : memref<3x2xf32, #tpu.memory_space<smem>>
    %18 = vector.broadcast %17 : f32 to vector<1x512xf32>
    %19 = arith.mulf %18, %1 : vector<1x512xf32>
    %c1_12 = arith.constant 1 : index
    %c1_13 = arith.constant 1 : index
    %20 = memref.load %arg1[%c1_12, %c1_13] : memref<3x2xf32, #tpu.memory_space<smem>>
    %21 = vector.broadcast %20 : f32 to vector<1x512xf32>
    %22 = arith.mulf %21, %3 : vector<1x512xf32>
    %23 = arith.addf %19, %22 : vector<1x512xf32>
    %c0_14 = arith.constant 0 : index
    %c1_15 = arith.constant 1 : index
    %24 = memref.load %arg2[%c0_14, %c1_15] : memref<1x3xf32, #tpu.memory_space<smem>>
    %25 = arith.mulf %23, %23 : vector<1x512xf32>
    %26 = vector.broadcast %24 : f32 to vector<1x512xf32>
    %27 = arith.mulf %26, %25 : vector<1x512xf32>
    %28 = arith.addf %16, %27 : vector<1x512xf32>
    %c2 = arith.constant 2 : index
    %c0_16 = arith.constant 0 : index
    %29 = memref.load %arg1[%c2, %c0_16] : memref<3x2xf32, #tpu.memory_space<smem>>
    %30 = vector.broadcast %29 : f32 to vector<1x512xf32>
    %31 = arith.mulf %30, %1 : vector<1x512xf32>
    %c2_17 = arith.constant 2 : index
    %c1_18 = arith.constant 1 : index
    %32 = memref.load %arg1[%c2_17, %c1_18] : memref<3x2xf32, #tpu.memory_space<smem>>
    %33 = vector.broadcast %32 : f32 to vector<1x512xf32>
    %34 = arith.mulf %33, %3 : vector<1x512xf32>
    %35 = arith.addf %31, %34 : vector<1x512xf32>
    %c0_19 = arith.constant 0 : index
    %c2_20 = arith.constant 2 : index
    %36 = memref.load %arg2[%c0_19, %c2_20] : memref<1x3xf32, #tpu.memory_space<smem>>
    %37 = arith.mulf %35, %35 : vector<1x512xf32>
    %38 = vector.broadcast %36 : f32 to vector<1x512xf32>
    %39 = arith.mulf %38, %37 : vector<1x512xf32>
    %40 = arith.addf %28, %39 : vector<1x512xf32>
    %c0_21 = arith.constant 0 : index
    %c0_22 = arith.constant 0 : index
    %41 = vector.load %arg4[%c0_21, %c0_22] : memref<1x512xf32, #tpu.memory_space<vmem>>, vector<1x512xf32>
    tpu.vector_store %arg4[%c0_21, %c0_22], %40 {strides = array<i32>} : memref<1x512xf32, #tpu.memory_space<vmem>>, vector<1x512xf32>,
    return
  }
  func.func @transform_0(%arg0: i32) -> (i32, i32) {
    %c0_i32 = arith.constant 0 : i32
    %c0_i32_0 = arith.constant 0 : i32
    %c0_i32_1 = arith.constant 0 : i32
    return %c0_i32, %c0_i32_0 : i32, i32
  }
  func.func @transform_1(%arg0: i32) -> (i32, i32) {
    %c0_i32 = arith.constant 0 : i32
    %c0_i32_0 = arith.constant 0 : i32
    %c0_i32_1 = arith.constant 0 : i32
    return %c0_i32, %c0_i32_0 : i32, i32
  }
  func.func @transform_2(%arg0: i32) -> (i32, i32, i32) {
    %c0_i32 = arith.constant 0 : i32
    %c0_i32_0 = arith.constant 0 : i32
    %c0_i32_1 = arith.constant 0 : i32
    return %c0_i32, %arg0, %c0_i32_0 : i32, i32, i32
  }
  func.func @transform_3(%arg0: i32) -> (i32, i32) {
    %c0_i32 = arith.constant 0 : i32
    %c0_i32_0 = arith.constant 0 : i32
    return %arg0, %c0_i32 : i32, i32
  }
}

</mosaic_0001>

<bundles_post_ra>
// kernel: tpu_custom_call.1
= control target key start
LH: loop header
LB: loop body
LE: loop exit
PB: predicated region body
PF: predicated region fallthrough
CT: control target
= control target key end

     0   :  { %8 = vsyncpa [#allocation4], 0  ;;  %s199_s0 = inlined_call_operand.vmem [shape: f32[3,2], index: 0, kind: input, shape index: {}]   ;;  %s200_s1 = inlined_call_operand.vmem [shape: f32[1,3], index: 1, kind: input, shape index: {}]   ;;  %s201_s2 = inlined_call_operand.vmem [shape: f32[2,1,512], index: 2, kind: input, shape index: {}]   ;;  %s202_s3 = inlined_call_operand.hbm [shape: f32[1,512], index: 3, kind: output, shape index: {}]  }
   0x1   :  { %9 = vsyncpa [#allocation6], 0 }
   0x2   :  { %10 = vsyncpa [#allocation3], 0  ;;  %s17_s14 = sshll.u32 %s199_s0, 4  ;;  %s27_s17 = sshll.u32 %s200_s1, 4  ;;  %s18_s14 = int_to_ptr.vmem [resolvable:$true] %s17_s14  ;;  %s28_s17 = int_to_ptr.vmem [resolvable:$true] %s27_s17 }
   0x3   :  { %s111_s18 = scalar_lea.vmem %s18_s14, 64  ;;  %p116_p1 = scmp.lt.s32.totalorder %s18_s14, %s18_s14 }
   0x4   :  { %p112_p0 = scmp.ne.s32.totalorder %s18_s14, %s111_s18  ;;  %p117_p2 = scmp.lt.s32.totalorder %s111_s18, %s111_s18 }
   0x6   :  { %p118_p3 = por %p117_p2, %p116_p1 }
   0x8   :  { %p119_p4 = pnand %p118_p3, %p112_p0 }
   0xa   :  { %122 = shalt.err (!%p119_p4)
}
   0xb   :  { %s161_s19 = smov [#allocation2]   ;;  %s123_s20 = scalar_lea.vmem %s28_s17, 16 }
   0xc   :  { %20 = dma.vmem_to_smem %s18_s14, 64, %s161_s19, [#allocation4]  }
   0xd   :  { %p124_p5 = scmp.ne.s32.totalorder %s28_s17, %s123_s20  ;;  %p128_p6 = scmp.lt.s32.totalorder %s28_s17, %s28_s17 }
   0xe   :  { %p129_p7 = scmp.lt.s32.totalorder %s123_s20, %s123_s20 }
  0x10   :  { %p130_p8 = por %p129_p7, %p128_p6 }
  0x12   :  { %p131_p9 = pnand %p130_p8, %p124_p5 }
  0x14   :  { %134 = shalt.err (!%p131_p9)
}
  0x15   :  { %s162_s0 = smov [#allocation5]  }
  0x16   :  { %30 = dma.vmem_to_smem %s28_s17, 16, %s162_s0, [#allocation6]  }
  0x17   :  { %155 = dma.done.wait [#allocation4], 64  }
  0x18   :  { %156 = vsyncadd [#allocation4], 4294967232 }
  0x19   :  { %157 = dma.done.wait [#allocation6], 16  }
  0x1a   :  { %158 = vsyncadd [#allocation6], 4294967280 }
  0x1b   :  { %39 = sfence }
  0x1c   :  { %s43_s1 = sld [smem:[#allocation2]]  ;;  %v40_v0 = vld [vmem:[%s201_s2] sm:$0xf]  ;;  %v100_v1 = vld [vmem:[%s201_s2 + $0x4] sm:$0xf]  ;;  %v79_v24 = vlaneseq  ;;  %s163_s2 = smov [#allocation7]  }
  0x1d   :  { %s101_s21 = sld [smem:[#allocation2 + $0x1]]  ;;  %s90_s6 = sshll.u32 %s163_s2, 4  ;;  %s91_s6 = int_to_ptr.vmem [resolvable:$true] %s90_s6 }
  0x1e   :  { %s50_s22 = sld [smem:[#allocation5]]  ;;  %vm81_vm0 = vcmp.lt.s32.totalorder %v79_v24, 512  ;;  %s135_s7 = scalar_lea.vmem %s91_s6, 64 }
  0x1f   :  { %s102_s23 = sld [smem:[#allocation2 + $0x80]]  ;;  %p136_p10 = scmp.ne.s32.totalorder %s91_s6, %s135_s7 }
  0x20   :  { %s103_s26 = sld [smem:[#allocation2 + $0x81]]  ;;  %p140_p11 = scmp.lt.s32.totalorder %s91_s6, %s91_s6 }
  0x21   :  { %s104_s29 = sld [smem:[#allocation5 + $0x1]]  ;;  %p141_p12 = scmp.lt.s32.totalorder %s135_s7, %s135_s7 }
  0x22   :  { %v44_v2 = vstv %s43_s1  ;;  %s105_s30 = sld [smem:[#allocation2 + $0x100]] }
  0x23   :  { %v45_v3 = vmul.f32 %v44_v2, %v40_v0  ;;  %v47_v4 = vstv %s101_s21  ;;  %s106_s4 = sld [smem:[#allocation2 + $0x101]]  ;;  %p142_p13 = por %p141_p12, %p140_p11 }
  0x24   :  { %v48_v5 = vmul.f32 %v100_v1, %v47_v4  ;;  %s107_s5 = sld [smem:[#allocation5 + $0x2]]  ;;  %v52_v12 = vstv %s50_s22 }
  0x25   :  { %v56_v6 = vstv %s102_s23  ;;  %p143_p0 = pnand %p142_p13, %p136_p10 }
  0x26   :  { %v49_v7 = vadd.f32 %v48_v5, %v45_v3  ;;  %v57_v8 = vmul.f32 %v56_v6, %v40_v0  ;;  %v59_v9 = vstv %s103_s26 }
  0x27   :  { %v60_v10 = vmul.f32 %v100_v1, %v59_v9  ;;  %v64_v17 = vstv %s104_s29 }
  0x28   :  { %v51_v11 = vmul.f32 %v49_v7, %v49_v7  ;;  %v68_v13 = vstv %s105_s30 }
  0x29   :  { %v61_v14 = vadd.f32 %v60_v10, %v57_v8  ;;  %v69_v15 = vmul.f32 %v68_v13, %v40_v0  ;;  %v71_v16 = vstv %s106_s4 }
  0x2a   :  { %v72_v18 = vmul.f32 %v100_v1, %v71_v16  ;;  %v53_v19 = vmul.f32 %v52_v12, %v51_v11  ;;  %v76_v23 = vstv %s107_s5 }
  0x2b   :  { %v63_v20 = vmul.f32 %v61_v14, %v61_v14 }
  0x2c   :  { %v73_v21 = vadd.f32 %v72_v18, %v69_v15 }
  0x2d   :  { %v65_v22 = vmul.f32 %v64_v17, %v63_v20 }
  0x2e   :  { %v75_v25 = vmul.f32 %v73_v21, %v73_v21 }
  0x2f   :  { %v66_v26 = vadd.f32 %v65_v22, %v53_v19 }
  0x30   :  { %v77_v27 = vmul.f32 %v76_v23, %v75_v25 }
  0x32   :  { %v78_v28 = vadd.f32 %v77_v27, %v66_v26 }
  0x34   :  { %83 = vst.msk [vmem:[#allocation7] sm:$0xf] %vm81_vm0, %v78_v28 }
  0x35   :  { %146 = shalt.err (!%p143_p0)
}
  0x36   :  { %93 = dma.vmem_to_hbm [thread:$0]  %s91_s6, 64, %s202_s3, [#allocation3]  }
  0x37   :  { %159 = dma.done.wait [#allocation3], 64  }
  0x38   :  { %160 = vsyncadd [#allocation3], 4294967232 }
  0x39   :  { %97 = vsyncpa [#allocation3], 1 }
  0x3a   :  { %98 = vsyncpa [#allocation4], 1 }
  0x3b   :  { %99 = vsyncpa [#allocation6], 1 }

</bundles_post_ra>
